<compile_context>
chip_gen: v7x
topology: tpu7x:2x2x1
jax: 0.10.0
libtpu: 0.0.40
codegen_flags: <defaults>
</compile_context>

<pallas_src>
import functools

import jax
import jax.numpy as jnp
from jax import lax
from jax.experimental import pallas as pl
from jax.experimental.pallas import tpu as pltpu


def funk_svd_kernel(uid_ref, iid_ref,        # VMEM (1, TB) int32 id tiles
                    emb_ut_ref, emb_it_ref,  # VMEM (K, n_user) / (K, n_item) tables
                    o_ref):                  # VMEM (1, TB) fp32 scores
    k_dim, n_user = emb_ut_ref.shape
    n_item = emb_it_ref.shape[1]
    tb = o_ref.shape[1]

    uid = uid_ref[...]                                    # (1, TB) int32
    iid = iid_ref[...]

    # One-hot selectors: rows on sublanes, batch on lanes.
    u_rows = lax.broadcasted_iota(jnp.int32, (n_user, tb), 0)
    i_rows = lax.broadcasted_iota(jnp.int32, (n_item, tb), 0)
    onehot_u = (u_rows == uid).astype(jnp.float32)        # (n_user, TB)
    onehot_i = (i_rows == iid).astype(jnp.float32)        # (n_item, TB)

    # Vectorized gather on the MXU: (K, n_rows) @ (n_rows, TB) -> (K, TB).
    u_g = jnp.dot(emb_ut_ref[...], onehot_u, preferred_element_type=jnp.float32)
    i_g = jnp.dot(emb_it_ref[...], onehot_i, preferred_element_type=jnp.float32)

    # Dot product over the latent dim (sublane axis); result stays lane-dense.
    o_ref[...] = jnp.sum(u_g * i_g, axis=0, keepdims=True)   # (1, TB)


def _round_up(x, m):
    return (x + m - 1) // m * m


@functools.partial(jax.jit, static_argnames=("batch_tile",))
def funk_svd_forward(user_ids, item_ids, emb_user, emb_item, *, batch_tile=256):
    """Pallas equivalent of FunkSvd.forward. Returns (B,) float32 scores."""
    B = user_ids.shape[0]
    n_user, k_dim = emb_user.shape
    n_item, k_dim_i = emb_item.shape
    assert k_dim == k_dim_i

    # Lane-dense batch tiling: tile size is a multiple of 128 lanes; pad batch.
    tb = min(batch_tile, _round_up(B, 128))
    b_pad = _round_up(B, tb)

    def pad_ids(ids):
        ids = ids.astype(jnp.int32)
        ids = jnp.pad(ids, (0, b_pad - B))       # pad with id 0; results discarded
        return ids.reshape(1, b_pad)

    uid2d = pad_ids(user_ids)
    iid2d = pad_ids(item_ids)

    # Layout plumbing: present tables as (K, n_rows) so gathered tiles are
    # (K, TB) and the output store is lane-dense.
    emb_ut = emb_user.astype(jnp.float32).T
    emb_it = emb_item.astype(jnp.float32).T

    # Explicit VMEM budget: resident tables + double-buffered id/out tiles +
    # in-kernel intermediates (one-hots, gathered tiles), 2x headroom, clamped
    # below v7x's 64 MiB physical VMEM.
    table_bytes = 4 * k_dim * (n_user + n_item)
    step_bytes = 4 * tb * (3 + n_user + n_item + 2 * k_dim)
    vmem_limit = int(min(max(2 * (table_bytes + 2 * step_bytes), 32 << 20), 48 << 20))

    grid_spec = pltpu.PrefetchScalarGridSpec(
        num_scalar_prefetch=0,
        grid=(b_pad // tb,),
        in_specs=[
            pl.BlockSpec((1, tb), lambda g: (0, g)),           # user id tile
            pl.BlockSpec((1, tb), lambda g: (0, g)),           # item id tile
            pl.BlockSpec((k_dim, n_user), lambda g: (0, 0)),   # resident user table^T
            pl.BlockSpec((k_dim, n_item), lambda g: (0, 0)),   # resident item table^T
        ],
        out_specs=pl.BlockSpec((1, tb), lambda g: (0, g)),
    )

    out = pl.pallas_call(
        funk_svd_kernel,
        out_shape=jax.ShapeDtypeStruct((1, b_pad), jnp.float32),
        grid_spec=grid_spec,
        compiler_params=pltpu.CompilerParams(
            dimension_semantics=("parallel",),   # megacore sharding on v7x
            vmem_limit_bytes=vmem_limit,
        ),
    )(uid2d, iid2d, emb_ut, emb_it)

    return out[0, :B]


if __name__ == "__main__":
    # Small deterministic configuration consistent with FunkSvd(n_user, n_item, k_dim).
    n_user, n_item, k_dim = 16, 24, 32
    batch = 8

    key = jax.random.PRNGKey(0)
    k_u, k_i, k_uid, k_iid = jax.random.split(key, 4)

    # The PyTorch init (normal mean=1, std=0) would make both tables all-ones;
    # use a deterministic perturbation around 1 so the check is nontrivial.
    # Quantize test values to bf16-representable fp32 so the one-hot MXU gather
    # is bit-exact regardless of the compiler's f32 matmul pass strategy.
    emb_user = (1.0 + 0.1 * jax.random.normal(k_u, (n_user, k_dim)))
    emb_item = (1.0 + 0.1 * jax.random.normal(k_i, (n_item, k_dim)))
    emb_user = emb_user.astype(jnp.bfloat16).astype(jnp.float32)
    emb_item = emb_item.astype(jnp.bfloat16).astype(jnp.float32)

    user_ids = jax.random.randint(k_uid, (batch,), 0, n_user, dtype=jnp.int32)
    item_ids = jax.random.randint(k_iid, (batch,), 0, n_item, dtype=jnp.int32)

    scores = funk_svd_forward(user_ids, item_ids, emb_user, emb_item)
    scores = jax.block_until_ready(scores)

    # Pure-JAX reference of the PyTorch forward.
    expected = jnp.sum(emb_user[user_ids] * emb_item[item_ids], axis=1)

    assert scores.shape == (batch,)
    assert jnp.allclose(scores, expected, atol=1e-4, rtol=1e-5), (scores, expected)
    print("KERNEL_OK")
</pallas_src>

<mosaic_0001>
module attributes {stable_mosaic.version = 11 : i64} {
  func.func @funk_svd_kernel(%arg0: i32, %arg1: memref<1x128xi32, #tpu.memory_space<vmem>>, %arg2: memref<1x128xi32, #tpu.memory_space<vmem>>, %arg3: memref<32x16xf32, #tpu.memory_space<vmem>>, %arg4: memref<32x24xf32, #tpu.memory_space<vmem>>, %arg5: memref<1x128xf32, #tpu.memory_space<vmem>>) attributes {dimension_semantics = [#tpu.dimension_semantics<parallel>], iteration_bounds = array<i64: 1>, scalar_prefetch = 0 : i64, scratch_operands = 0 : i64, tpu.core_type = #tpu.core_type<tc>, window_params = [{transform_indices = @transform_0, window_bounds = array<i64: 1, 128>}, {transform_indices = @transform_1, window_bounds = array<i64: 1, 128>}, {pipeline_mode = #tpu.pipeline_mode<synchronous>, transform_indices = @transform_2, window_bounds = array<i64: 32, 16>}, {pipeline_mode = #tpu.pipeline_mode<synchronous>, transform_indices = @transform_3, window_bounds = array<i64: 32, 24>}, {transform_indices = @transform_4, window_bounds = array<i64: 1, 128>}]} {
    %c0 = arith.constant 0 : index
    %c0_0 = arith.constant 0 : index
    %0 = vector.load %arg1[%c0, %c0_0] : memref<1x128xi32, #tpu.memory_space<vmem>>, vector<1x128xi32>
    %c0_1 = arith.constant 0 : index
    %c0_2 = arith.constant 0 : index
    %1 = vector.load %arg2[%c0_1, %c0_2] : memref<1x128xi32, #tpu.memory_space<vmem>>, vector<1x128xi32>
    %2 = tpu.iota {dimensions = array<i32: 0>} : vector<16x128xi32>
    %3 = tpu.iota {dimensions = array<i32: 0>} : vector<24x128xi32>
    %4 = vector.broadcast %0 : vector<1x128xi32> to vector<16x128xi32>
    %5 = arith.cmpi eq, %2, %4 : vector<16x128xi32>
    %6 = arith.extui %5 : vector<16x128xi1> to vector<16x128xi32>
    %7 = arith.sitofp %6 : vector<16x128xi32> to vector<16x128xf32>
    %8 = vector.broadcast %1 : vector<1x128xi32> to vector<24x128xi32>
    %9 = arith.cmpi eq, %3, %8 : vector<24x128xi32>
    %10 = arith.extui %9 : vector<24x128xi1> to vector<24x128xi32>
    %11 = arith.sitofp %10 : vector<24x128xi32> to vector<24x128xf32>
    %c0_3 = arith.constant 0 : index
    %c0_4 = arith.constant 0 : index
    %12 = vector.load %arg3[%c0_3, %c0_4] : memref<32x16xf32, #tpu.memory_space<vmem>>, vector<32x16xf32>
    %cst = arith.constant dense<0.000000e+00> : vector<32x128xf32>
    %13 = tpu.matmul %12, %7, %cst {dimension_numbers = #tpu.dot_dimension_numbers<[1], [0], [0], [1], [0, 0, 1, 1], [], []>} : vector<32x16xf32>, vector<16x128xf32>, vector<32x128xf32> -> vector<32x128xf32>
    %c0_5 = arith.constant 0 : index
    %c0_6 = arith.constant 0 : index
    %14 = vector.load %arg4[%c0_5, %c0_6] : memref<32x24xf32, #tpu.memory_space<vmem>>, vector<32x24xf32>
    %cst_7 = arith.constant dense<0.000000e+00> : vector<32x128xf32>
    %15 = tpu.matmul %14, %11, %cst_7 {dimension_numbers = #tpu.dot_dimension_numbers<[1], [0], [0], [1], [0, 0, 1, 1], [], []>} : vector<32x24xf32>, vector<24x128xf32>, vector<32x128xf32> -> vector<32x128xf32>
    %16 = arith.mulf %13, %15 : vector<32x128xf32>
    %cst_8 = arith.constant dense<0.000000e+00> : vector<128xf32>
    %17 = vector.multi_reduction <add>, %16, %cst_8 [0] : vector<32x128xf32> to vector<128xf32>
    %18 = vector.shape_cast %17 : vector<128xf32> to vector<1x128xf32>
    %c0_9 = arith.constant 0 : index
    %c0_10 = arith.constant 0 : index
    %19 = vector.load %arg5[%c0_9, %c0_10] : memref<1x128xf32, #tpu.memory_space<vmem>>, vector<1x128xf32>
    tpu.vector_store %arg5[%c0_9, %c0_10], %18 {strides = array<i32>} : memref<1x128xf32, #tpu.memory_space<vmem>>, vector<1x128xf32>,
    return
  }
  func.func @transform_0(%arg0: i32) -> (i32, i32) {
    %c0_i32 = arith.constant 0 : i32
    %c0_i32_0 = arith.constant 0 : i32
    return %c0_i32, %arg0 : i32, i32
  }
  func.func @transform_1(%arg0: i32) -> (i32, i32) {
    %c0_i32 = arith.constant 0 : i32
    %c0_i32_0 = arith.constant 0 : i32
    return %c0_i32, %arg0 : i32, i32
  }
  func.func @transform_2(%arg0: i32) -> (i32, i32) {
    %c0_i32 = arith.constant 0 : i32
    %c0_i32_0 = arith.constant 0 : i32
    %c0_i32_1 = arith.constant 0 : i32
    return %c0_i32, %c0_i32_0 : i32, i32
  }
  func.func @transform_3(%arg0: i32) -> (i32, i32) {
    %c0_i32 = arith.constant 0 : i32
    %c0_i32_0 = arith.constant 0 : i32
    %c0_i32_1 = arith.constant 0 : i32
    return %c0_i32, %c0_i32_0 : i32, i32
  }
  func.func @transform_4(%arg0: i32) -> (i32, i32) {
    %c0_i32 = arith.constant 0 : i32
    %c0_i32_0 = arith.constant 0 : i32
    return %c0_i32, %arg0 : i32, i32
  }
}

</mosaic_0001>

<bundles_post_ra>
// kernel: funk_svd_forward.1
= control target key start
LH: loop header
LB: loop body
LE: loop exit
PB: predicated region body
PF: predicated region fallthrough
CT: control target
= control target key end

     0   :  { %v19_v0 = vlaneseq  ;;  %vm50_vm0 = vcmask 130048   ;;  %vm152_vm1 = vcmask 195584   ;;  %v333_v8 = vmov 1.0|1.0   ;;  %s401_s1 = inlined_call_operand.vmem [shape: s32[1,128], index: 1, kind: input, shape index: {}]   ;;  %s402_s0 = inlined_call_operand.vmem [shape: s32[1,128], index: 0, kind: input, shape index: {}]   ;;  %s403_s2 = inlined_call_operand.vmem [shape: f32[32,16], index: 2, kind: input, shape index: {}]   ;;  %s404_s3 = inlined_call_operand.vmem [shape: f32[32,24], index: 3, kind: input, shape index: {}]   ;;  %s405_s4 = inlined_call_operand.vmem [shape: f32[1,128], index: 4, kind: output, shape index: {}]  }
   0x1   :  { %v271_v1 = vld [vmem:[%s401_s1] ss:$0 sm:$0xff]  ;;  %v334_v9 = vmov 1.0   ;;  %v47_v10 = vld [vmem:[%s403_s2 + $0x8] sm:$0xff]  ;;  %v48_v12 = vld [vmem:[%s403_s2 + $0x10] sm:$0xff] }
   0x2   :  { %v46_v2 = vld [vmem:[%s403_s2] sm:$0xff]  ;;  %v20_v3 = vshrl.u32 %v19_v0, 7  ;;  %v149_v11 = vld [vmem:[%s404_s3 + $0x8] sm:$0xff]  ;;  %v150_v13 = vld [vmem:[%s404_s3 + $0x10] sm:$0xff] }
   0x3   :  { %v268_v4 = vld [vmem:[%s402_s0] ss:$0 sm:$0xff]  ;;  %305 = vmatprep.mubr.msk.f32.mxu0 %vm50_vm0, %v46_v2  ;;  %v49_v14 = vld [vmem:[%s403_s2 + $0x18] sm:$0xff] }
   0x4   :  { %v148_v5 = vld [vmem:[%s404_s3] sm:$0xff]  ;;  %v21_v6 = vadd.s32 8, %v20_v3  ;;  %vm37_vm2 = vcmp.eq.s32.totalorder %v20_v3, %v271_v1  ;;  %v22_v7 = vadd.s32 16, %v20_v3  ;;  %vm27_vm3 = vcmp.eq.s32.totalorder %v20_v3, %v268_v4  ;;  %v151_v15 = vld [vmem:[%s404_s3 + $0x18] sm:$0xff] }
   0x5   :  { %317 = vmatprep.mubr.msk.f32.mxu1 %vm152_vm1, %v148_v5 }
   0x6   :  { %vm38_vm4 = vcmp.eq.s32.totalorder %v21_v6, %v271_v1  ;;  %vm28_vm5 = vcmp.eq.s32.totalorder %v21_v6, %v268_v4  ;;  %vm39_vm7 = vcmp.eq.s32.totalorder %v22_v7, %v271_v1 }
   0x7   :  { %vm327_vm6 = vmpackc.low %vm38_vm4, %vm37_vm2 }
   0x8   :  { %328 = vmatprep.subr.msk.bf16.mxu1 %vm327_vm6, %v333_v8  ;;  %vm323_vm8 = vmpackc.low %vm28_vm5, %vm27_vm3 }
   0x9   :  { %324 = vmatprep.subr.msk.bf16.mxu0 %vm323_vm8, %v333_v8  ;;  %330 = vmatpush3.bf16.msk.msra.mxu1 %vm327_vm6, %v333_v8 }
   0xa   :  { %326 = vmatpush3.bf16.msk.msra.mxu0 %vm323_vm8, %v333_v8  ;;  %315 = vmatprep.subr.msk.mxu1 %vm39_vm7, %v334_v9 }
   0xd   :  { %306 = vmatmul.mubr.msk.f32.vlgmr.msra.gmra.mrb[0].mxu0 %vm50_vm0, %v47_v10  ;;  %316 = vmatpush3.msk.msra.mxu1 %vm39_vm7, %v334_v9 }
   0xe   :  { %318 = vmatmul.mubr.msk.f32.vlgmr.msra.gmra.mrb[0].mxu1 %vm152_vm1, %v149_v11  ;;  %308 = vmatprep.mubr.msk.f32.mxu0 %vm50_vm0, %v48_v12 }
   0xf   :  { %320 = vmatprep.mubr.msk.f32.mxu1 %vm152_vm1, %v150_v13 }
  0x11   :  { %309 = vmatmul.mubr.msk.f32.gmra.mrb[2].mxu0 %vm50_vm0, %v49_v14 }
  0x12   :  { %321 = vmatmul.mubr.msk.f32.gmra.mrb[2].mxu1 %vm152_vm1, %v151_v15 }
  0xe0   :  { %v307_v16 = vpop.f32.mrb[0].mxu0 }
  0xe1   :  { %v129_v17 = vpop.f32.mrb[1].mxu0  ;;  %v319_v18 = vpop.f32.mrb[0].mxu1 }
  0xe2   :  { %v251_v19 = vmul.f32 %v319_v18, %v307_v16  ;;  %v231_v20 = vpop.f32.mrb[1].mxu1 }
  0xe3   :  { %v250_v21 = vmul.f32 %v231_v20, %v129_v17 }
  0xe4   :  { %v310_v22 = vpop.f32.mrb[2].mxu0 }
  0xe5   :  { %v254_v23 = vadd.f32 %v251_v19, %v250_v21  ;;  %v139_v24 = vpop.f32.mrb[3].mxu0  ;;  %v322_v25 = vpop.f32.mrb[2].mxu1 }
  0xe6   :  { %v253_v26 = vmul.f32 %v322_v25, %v310_v22  ;;  %v241_v27 = vpop.f32.mrb[3].mxu1 }
  0xe7   :  { %v252_v28 = vmul.f32 %v241_v27, %v139_v24 }
  0xe9   :  { %v255_v29 = vadd.f32 %v254_v23, %v252_v28 }
  0xeb   :  { %v256_v30 = vadd.f32 %v255_v29, %v253_v26 }
  0xed   :  { %v257_v31 = vrot.slane %v256_v30, 4 }
  0xef   :  { %v258_v32 = vadd.f32 %v257_v31, %v256_v30 }
  0xf1   :  { %v259_v33 = vrot.slane %v258_v32, 2 }
  0xf3   :  { %v260_v34 = vadd.f32 %v259_v33, %v258_v32 }
  0xf5   :  { %v261_v35 = vrot.slane %v260_v34, 1 }
  0xf7   :  { %v262_v36 = vadd.f32 %v261_v35, %v260_v34 }
  0xf9   :  { %263 = vst [vmem:[%s405_s4] sm:$0x1] %v262_v36 }

</bundles_post_ra>
